<compile_context>
chip_gen: v7x
topology: tpu7x:2x2x1
jax: 0.10.0
libtpu: 0.0.40
codegen_flags: <defaults>
</compile_context>

<pallas_src>
import functools
import math

import jax
import jax.numpy as jnp
from jax import lax
from jax.experimental import pallas as pl
from jax.experimental.pallas import tpu as pltpu


def _round_up(n: int, m: int) -> int:
    return ((n + m - 1) // m) * m


def cross_attention_kernel(x_ref, y_ref, wqT_ref, bq_ref, wkvT_ref, bkv_ref,
                           o_ref, kv_scr, *, ny_real):
    # x_ref:   (1, TQ, Dp)        y_ref:    (1, Nyp, Dp)
    # wqT_ref: (Dp, Dp)           bq_ref:   (1, Dp)        [scale pre-folded]
    # wkvT_ref:(Dp, 2*Dp)         bkv_ref:  (1, 2*Dp)
    # o_ref:   (1, TQ, Dp)        kv_scr:   (Nyp, 2*Dp) VMEM scratch
    qi = pl.program_id(1)
    Dp = o_ref.shape[-1]

    # K/V projection: once per batch element (query-tile axis is sequential
    # / 'arbitrary', so the scratch persists across qi for this batch).
    @pl.when(qi == 0)
    def _():
        y = y_ref[0]                                                   # (Nyp, Dp)
        kv = jnp.dot(y, wkvT_ref[...],
                     preferred_element_type=jnp.float32) + bkv_ref[...]
        kv_scr[...] = kv.astype(kv_scr.dtype)

    x = x_ref[0]                                                       # (TQ, Dp)
    q = jnp.dot(x, wqT_ref[...],
                preferred_element_type=jnp.float32) + bq_ref[...]
    q = q.astype(x.dtype)                      # 1/sqrt(D) already folded into Wq/bq

    k = kv_scr[:, :Dp]                                                 # (Nyp, Dp)
    v = kv_scr[:, Dp:]                                                 # (Nyp, Dp)

    # scores = q @ k^T, contracting the last dims directly (no explicit transpose).
    scores = lax.dot_general(q, k, (((1,), (1,)), ((), ())),
                             preferred_element_type=jnp.float32)       # (TQ, Nyp)

    if scores.shape[-1] != ny_real:            # static branch: mask padded keys
        lane = lax.broadcasted_iota(jnp.int32, scores.shape, 1)
        scores = jnp.where(lane < ny_real, scores, jnp.float32(-1e30))

    scores = scores - jnp.max(scores, axis=-1, keepdims=True)
    p = jnp.exp(scores)
    inv = pl.reciprocal(jnp.sum(p, axis=-1, keepdims=True), approx=True)
    p = (p * inv).astype(kv_scr.dtype)

    out = jnp.dot(p, v, preferred_element_type=jnp.float32)            # (TQ, Dp)
    o_ref[0] = out.astype(o_ref.dtype)


def cross_attention(x, y, wq, bq, wkv, bkv, *, tq=256):
    B, Nx, D = x.shape
    _, Ny, _ = y.shape
    assert y.shape == (B, Ny, D)
    assert wq.shape == (D, D) and bq.shape == (D,)
    assert wkv.shape == (2 * D, D) and bkv.shape == (2 * D,)

    dtype = x.dtype
    scale = 1.0 / math.sqrt(D)

    # Split the fused kv projection (nn.Linear weight is (out, in)).
    wk, wv = wkv[:D], wkv[D:]
    bk, bv = bkv[:D], bkv[D:]

    # Lane-dense feature dim (multiple of 128); zero padding does not change results.
    Dp = _round_up(D, 128)
    # Query tile: multiple of 8 sublanes, capped by the (padded) query length.
    TQ = min(tq, _round_up(Nx, 8))
    Nxp = _round_up(Nx, TQ)
    # Key length padded to a lane-dense score matrix; padded keys are masked.
    Nyp = _round_up(Ny, 128)
    pad_d, pad_nx, pad_ny = Dp - D, Nxp - Nx, Nyp - Ny

    # Pre-transpose weights, fold the softmax scale into the q projection, and
    # fuse k/v weights into a single (Dp, 2*Dp) matrix (layout/algebra plumbing
    # on the small weights, done once in the wrapper).
    wqTp = jnp.pad((wq.T * scale).astype(dtype), ((0, pad_d), (0, pad_d)))
    bqp = jnp.pad((bq * scale).astype(jnp.float32), (0, pad_d)).reshape(1, Dp)
    wkvTp = jnp.concatenate(
        [jnp.pad(wk.T, ((0, pad_d), (0, pad_d))),
         jnp.pad(wv.T, ((0, pad_d), (0, pad_d)))], axis=1).astype(dtype)
    bkvp = jnp.concatenate(
        [jnp.pad(bk, (0, pad_d)), jnp.pad(bv, (0, pad_d))]
    ).reshape(1, 2 * Dp).astype(jnp.float32)

    xp = jnp.pad(x, ((0, 0), (0, pad_nx), (0, pad_d)))
    yp = jnp.pad(y, ((0, 0), (0, pad_ny), (0, pad_d)))

    # TODO(synk): for very long Ny, add an Ny tile axis with online softmax; here
    # K/V stay resident per batch element in VMEM scratch.
    out = pl.pallas_call(
        functools.partial(cross_attention_kernel, ny_real=Ny),
        out_shape=jax.ShapeDtypeStruct((B, Nxp, Dp), dtype),
        grid_spec=pltpu.PrefetchScalarGridSpec(
            num_scalar_prefetch=0,
            grid=(B, Nxp // TQ),
            in_specs=[
                pl.BlockSpec((1, TQ, Dp), lambda b, qi: (b, qi, 0)),     # x tile
                pl.BlockSpec((1, Nyp, Dp), lambda b, qi: (b, 0, 0)),     # y (full, per batch)
                pl.BlockSpec((Dp, Dp), lambda b, qi: (0, 0)),            # Wq^T (scaled)
                pl.BlockSpec((1, Dp), lambda b, qi: (0, 0)),             # bq   (scaled)
                pl.BlockSpec((Dp, 2 * Dp), lambda b, qi: (0, 0)),        # [Wk^T | Wv^T]
                pl.BlockSpec((1, 2 * Dp), lambda b, qi: (0, 0)),         # [bk | bv]
            ],
            out_specs=pl.BlockSpec((1, TQ, Dp), lambda b, qi: (b, qi, 0)),
            scratch_shapes=[
                pltpu.VMEM((Nyp, 2 * Dp), dtype),   # fused K|V, projected once per batch elem
            ],
        ),
        compiler_params=pltpu.CompilerParams(
            dimension_semantics=("parallel", "arbitrary"),
            vmem_limit_bytes=64 * 1024 * 1024,
        ),
    )(xp, yp, wqTp, bqp, wkvTp, bkvp)

    return out[:, :Nx, :D]


def reference(x, y, wq, bq, wkv, bkv):
    d = x.shape[-1]
    q = jnp.einsum("bnd,ed->bne", x, wq) + bq
    kv = jnp.einsum("bnd,ed->bne", y, wkv) + bkv
    k, v = kv[..., :d], kv[..., d:]
    attn = jnp.einsum("bqd,bkd->bqk", q, k) / math.sqrt(d)
    attn = jax.nn.softmax(attn, axis=-1)
    return jnp.einsum("bqk,bkd->bqd", attn, v)


if __name__ == "__main__":
    B, Nx, Ny, D = 2, 8, 8, 32

    key = jax.random.PRNGKey(0)
    kx, ky, kwq, kbq, kwkv, kbkv = jax.random.split(key, 6)

    x = jax.random.normal(kx, (B, Nx, D), dtype=jnp.float32)
    y = jax.random.normal(ky, (B, Ny, D), dtype=jnp.float32)

    # Deterministic parameter init (nn.Linear shapes: W is (out, in)).
    bound = 1.0 / math.sqrt(D)
    wq = jax.random.uniform(kwq, (D, D), minval=-bound, maxval=bound, dtype=jnp.float32)
    bq = jax.random.uniform(kbq, (D,), minval=-bound, maxval=bound, dtype=jnp.float32)
    wkv = jax.random.uniform(kwkv, (2 * D, D), minval=-bound, maxval=bound, dtype=jnp.float32)
    bkv = jax.random.uniform(kbkv, (2 * D,), minval=-bound, maxval=bound, dtype=jnp.float32)

    out = cross_attention(x, y, wq, bq, wkv, bkv)
    out = jax.block_until_ready(out)

    ref = reference(x, y, wq, bq, wkv, bkv)
    assert out.shape == (B, Nx, D)
    # Tolerance loosened slightly vs. 1e-4 because the softmax normalization uses
    # the EUP approximate reciprocal.
    assert jnp.allclose(out, ref, atol=2e-3, rtol=2e-3), "mismatch vs reference"

    print("KERNEL_OK")
</pallas_src>

<mosaic_0001>
module attributes {stable_mosaic.version = 11 : i64} {
  func.func @cross_attention_kernel(%arg0: i32, %arg1: i32, %arg2: memref<1x8x128xf32, #tpu.memory_space<vmem>>, %arg3: memref<1x128x128xf32, #tpu.memory_space<vmem>>, %arg4: memref<128x128xf32, #tpu.memory_space<vmem>>, %arg5: memref<1x128xf32, #tpu.memory_space<vmem>>, %arg6: memref<128x256xf32, #tpu.memory_space<vmem>>, %arg7: memref<1x256xf32, #tpu.memory_space<vmem>>, %arg8: memref<1x8x128xf32, #tpu.memory_space<vmem>>, %arg9: memref<128x256xf32, #tpu.memory_space<vmem>>) attributes {dimension_semantics = [#tpu.dimension_semantics<parallel>, #tpu.dimension_semantics<arbitrary>], iteration_bounds = array<i64: 2, 1>, scalar_prefetch = 0 : i64, scratch_operands = 1 : i64, tpu.core_type = #tpu.core_type<tc>, window_params = [{transform_indices = @transform_0, window_bounds = array<i64: 1, 8, 128>}, {transform_indices = @transform_1, window_bounds = array<i64: 1, 128, 128>}, {pipeline_mode = #tpu.pipeline_mode<synchronous>, transform_indices = @transform_2, window_bounds = array<i64: 128, 128>}, {pipeline_mode = #tpu.pipeline_mode<synchronous>, transform_indices = @transform_3, window_bounds = array<i64: 1, 128>}, {pipeline_mode = #tpu.pipeline_mode<synchronous>, transform_indices = @transform_4, window_bounds = array<i64: 128, 256>}, {pipeline_mode = #tpu.pipeline_mode<synchronous>, transform_indices = @transform_5, window_bounds = array<i64: 1, 256>}, {transform_indices = @transform_6, window_bounds = array<i64: 1, 8, 128>}]} {
    %c0_i32 = arith.constant 0 : i32
    %0 = arith.cmpi eq, %arg1, %c0_i32 : i32
    %1 = arith.extui %0 : i1 to i32
    %c0_i32_0 = arith.constant 0 : i32
    %2 = arith.cmpi ne, %1, %c0_i32_0 : i32
    scf.if %2 {
      %c0_18 = arith.constant 0 : index
      %c0_19 = arith.constant 0 : index
      %c0_20 = arith.constant 0 : index
      %32 = vector.load %arg3[%c0_18, %c0_19, %c0_20] : memref<1x128x128xf32, #tpu.memory_space<vmem>>, vector<1x128x128xf32>
      %33 = vector.shape_cast %32 : vector<1x128x128xf32> to vector<128x128xf32>
      %c0_21 = arith.constant 0 : index
      %c0_22 = arith.constant 0 : index
      %34 = vector.load %arg6[%c0_21, %c0_22] : memref<128x256xf32, #tpu.memory_space<vmem>>, vector<128x256xf32>
      %cst_23 = arith.constant dense<0.000000e+00> : vector<128x256xf32>
      %35 = tpu.matmul %33, %34, %cst_23 {dimension_numbers = #tpu.dot_dimension_numbers<[1], [0], [0], [1], [0, 0, 1, 1], [], []>} : vector<128x128xf32>, vector<128x256xf32>, vector<128x256xf32> -> vector<128x256xf32>
      %c0_24 = arith.constant 0 : index
      %c0_25 = arith.constant 0 : index
      %36 = vector.load %arg7[%c0_24, %c0_25] : memref<1x256xf32, #tpu.memory_space<vmem>>, vector<1x256xf32>
      %37 = vector.broadcast %36 : vector<1x256xf32> to vector<128x256xf32>
      %38 = arith.addf %35, %37 : vector<128x256xf32>
      %c0_26 = arith.constant 0 : index
      %c0_27 = arith.constant 0 : index
      %39 = vector.load %arg9[%c0_26, %c0_27] : memref<128x256xf32, #tpu.memory_space<vmem>>, vector<128x256xf32>
      tpu.vector_store %arg9[%c0_26, %c0_27], %38 {strides = array<i32>} : memref<128x256xf32, #tpu.memory_space<vmem>>, vector<128x256xf32>,
    } else {
    }
    %c0 = arith.constant 0 : index
    %c0_1 = arith.constant 0 : index
    %c0_2 = arith.constant 0 : index
    %3 = vector.load %arg2[%c0, %c0_1, %c0_2] : memref<1x8x128xf32, #tpu.memory_space<vmem>>, vector<1x8x128xf32>
    %4 = vector.shape_cast %3 : vector<1x8x128xf32> to vector<8x128xf32>
    %c0_3 = arith.constant 0 : index
    %c0_4 = arith.constant 0 : index
    %5 = vector.load %arg4[%c0_3, %c0_4] : memref<128x128xf32, #tpu.memory_space<vmem>>, vector<128x128xf32>
    %cst = arith.constant dense<0.000000e+00> : vector<8x128xf32>
    %6 = tpu.matmul %4, %5, %cst {dimension_numbers = #tpu.dot_dimension_numbers<[1], [0], [0], [1], [0, 0, 1, 1], [], []>} : vector<8x128xf32>, vector<128x128xf32>, vector<8x128xf32> -> vector<8x128xf32>
    %c0_5 = arith.constant 0 : index
    %c0_6 = arith.constant 0 : index
    %7 = vector.load %arg5[%c0_5, %c0_6] : memref<1x128xf32, #tpu.memory_space<vmem>>, vector<1x128xf32>
    %8 = vector.broadcast %7 : vector<1x128xf32> to vector<8x128xf32>
    %9 = arith.addf %6, %8 : vector<8x128xf32>
    %c0_7 = arith.constant 0 : index
    %c0_8 = arith.constant 0 : index
    %10 = vector.load %arg9[%c0_7, %c0_8] : memref<128x256xf32, #tpu.memory_space<vmem>>, vector<128x128xf32>
    %c0_9 = arith.constant 0 : index
    %c128 = arith.constant 128 : index
    %11 = vector.load %arg9[%c0_9, %c128] : memref<128x256xf32, #tpu.memory_space<vmem>>, vector<128x128xf32>
    %cst_10 = arith.constant dense<0.000000e+00> : vector<8x128xf32>
    %12 = tpu.matmul %9, %10, %cst_10 {dimension_numbers = #tpu.dot_dimension_numbers<[1], [1], [0], [0], [0, 0, 1, 0], [], []>} : vector<8x128xf32>, vector<128x128xf32>, vector<8x128xf32> -> vector<8x128xf32>
    %13 = tpu.iota {dimensions = array<i32: 1>} : vector<8x128xi32>
    %c8_i32 = arith.constant 8 : i32
    %14 = vector.broadcast %c8_i32 : i32 to vector<8x128xi32>
    %15 = arith.cmpi slt, %13, %14 : vector<8x128xi32>
    %cst_11 = arith.constant -1.000000e+30 : f32
    %16 = vector.broadcast %cst_11 : f32 to vector<8x128xf32>
    %17 = arith.select %15, %12, %16 : vector<8x128xi1>, vector<8x128xf32>
    %cst_12 = arith.constant dense<0xFF800000> : vector<8xf32>
    %18 = vector.multi_reduction <maximumf>, %17, %cst_12 [1] : vector<8x128xf32> to vector<8xf32>
    %19 = vector.shape_cast %18 : vector<8xf32> to vector<8x1xf32>
    %20 = vector.broadcast %19 : vector<8x1xf32> to vector<8x128xf32>
    %21 = arith.subf %17, %20 : vector<8x128xf32>
    %22 = math.exp %21 : vector<8x128xf32>
    %cst_13 = arith.constant dense<0.000000e+00> : vector<8xf32>
    %23 = vector.multi_reduction <add>, %22, %cst_13 [1] : vector<8x128xf32> to vector<8xf32>
    %24 = vector.shape_cast %23 : vector<8xf32> to vector<8x1xf32>
    %25 = tpu.reciprocal %24 {approx = true} : vector<8x1xf32> -> vector<8x1xf32>
    %26 = vector.broadcast %25 : vector<8x1xf32> to vector<8x128xf32>
    %27 = arith.mulf %22, %26 : vector<8x128xf32>
    %cst_14 = arith.constant dense<0.000000e+00> : vector<8x128xf32>
    %28 = tpu.matmul %27, %11, %cst_14 {dimension_numbers = #tpu.dot_dimension_numbers<[1], [0], [0], [1], [0, 0, 1, 1], [], []>} : vector<8x128xf32>, vector<128x128xf32>, vector<8x128xf32> -> vector<8x128xf32>
    %c0_15 = arith.constant 0 : index
    %c0_16 = arith.constant 0 : index
    %c0_17 = arith.constant 0 : index
    %29 = vector.load %arg8[%c0_15, %c0_16, %c0_17] : memref<1x8x128xf32, #tpu.memory_space<vmem>>, vector<1x8x128xf32>
    %30 = vector.shape_cast %29 : vector<1x8x128xf32> to vector<8x128xf32>
    %31 = vector.shape_cast %28 : vector<8x128xf32> to vector<1x8x128xf32>
    tpu.vector_store %arg8[%c0_15, %c0_16, %c0_17], %31 {strides = array<i32>} : memref<1x8x128xf32, #tpu.memory_space<vmem>>, vector<1x8x128xf32>,
    return
  }
  func.func @transform_0(%arg0: i32, %arg1: i32) -> (i32, i32, i32) {
    %c0_i32 = arith.constant 0 : i32
    %c0_i32_0 = arith.constant 0 : i32
    return %arg0, %arg1, %c0_i32 : i32, i32, i32
  }
  func.func @transform_1(%arg0: i32, %arg1: i32) -> (i32, i32, i32) {
    %c0_i32 = arith.constant 0 : i32
    %c0_i32_0 = arith.constant 0 : i32
    %c0_i32_1 = arith.constant 0 : i32
    return %arg0, %c0_i32, %c0_i32_0 : i32, i32, i32
  }
  func.func @transform_2(%arg0: i32, %arg1: i32) -> (i32, i32) {
    %c0_i32 = arith.constant 0 : i32
    %c0_i32_0 = arith.constant 0 : i32
    %c0_i32_1 = arith.constant 0 : i32
    return %c0_i32, %c0_i32_0 : i32, i32
  }
  func.func @transform_3(%arg0: i32, %arg1: i32) -> (i32, i32) {
    %c0_i32 = arith.constant 0 : i32
    %c0_i32_0 = arith.constant 0 : i32
    %c0_i32_1 = arith.constant 0 : i32
    return %c0_i32, %c0_i32_0 : i32, i32
  }
  func.func @transform_4(%arg0: i32, %arg1: i32) -> (i32, i32) {
    %c0_i32 = arith.constant 0 : i32
    %c0_i32_0 = arith.constant 0 : i32
    %c0_i32_1 = arith.constant 0 : i32
    return %c0_i32, %c0_i32_0 : i32, i32
  }
  func.func @transform_5(%arg0: i32, %arg1: i32) -> (i32, i32) {
    %c0_i32 = arith.constant 0 : i32
    %c0_i32_0 = arith.constant 0 : i32
    %c0_i32_1 = arith.constant 0 : i32
    return %c0_i32, %c0_i32_0 : i32, i32
  }
  func.func @transform_6(%arg0: i32, %arg1: i32) -> (i32, i32, i32) {
    %c0_i32 = arith.constant 0 : i32
    %c0_i32_0 = arith.constant 0 : i32
    return %arg0, %arg1, %c0_i32 : i32, i32, i32
  }
}

</mosaic_0001>

<bundles_post_ra>
// kernel: tpu_custom_call.1
= control target key start
LH: loop header
LB: loop body
LE: loop exit
PB: predicated region body
PF: predicated region fallthrough
CT: control target
= control target key end

     0   :  { %s2260_s0 = inlined_call_operand.hbm [shape: f32[2,8,128], index: 0, kind: input, shape index: {}]   ;;  %s2261_s1 = inlined_call_operand.hbm [shape: f32[2,128,128], index: 1, kind: input, shape index: {}]   ;;  %s2262_s2 = inlined_call_operand.hbm [shape: f32[128,128], index: 2, kind: input, shape index: {}]   ;;  %s2263_s3 = inlined_call_operand.hbm [shape: f32[1,128], index: 3, kind: input, shape index: {}]   ;;  %s2264_s4 = inlined_call_operand.hbm [shape: f32[128,256], index: 4, kind: input, shape index: {}]   ;;  %s2265_s5 = inlined_call_operand.hbm [shape: f32[1,256], index: 5, kind: input, shape index: {}]   ;;  %s2266_s6 = inlined_call_operand.hbm [shape: f32[2,8,128], index: 6, kind: output, shape index: {}]  }
   0x1   :  { %2272 = sst [smem:[#allocation21_spill]] %s2260_s0 }
   0x2   :  { %2273 = sst [smem:[#allocation22_spill]] %s2262_s2 }
   0x3   :  { %2274 = sst [smem:[#allocation23_spill]] %s2263_s3 }
   0x4   :  { %2275 = sst [smem:[#allocation24_spill]] %s2264_s4 }
   0x5   :  { %11 = vsyncpa [#allocation4], 0 }
   0x6   :  { %13 = vsyncpa [#allocation4 + $0x1], 0 }
   0x7   :  { %14 = vsyncpa [#allocation7], 0 }
   0x8   :  { %16 = vsyncpa [#allocation7 + $0x1], 0 }
   0x9   :  { %17 = vsyncpa [#allocation10], 0 }
   0xa   :  { %18 = vsyncpa [#allocation13], 0 }
   0xb   :  { %19 = vsyncpa [#allocation5], 0 }
   0xc   :  { %21 = vsyncpa [#allocation5 + $0x1], 0  ;;  %s1798_s21 = smov 0   ;;  %s1800_s22 = smov 0  }
   0xd   :  { %s1802_s23 = smov 0   ;;  %s1804_s24 = smov 0  }
   0xe   :  { %s1806_s25 = smov 0   ;;  %s1808_s26 = smov 0  }
   0xf LB: > { %s1829_s27 = sadd.s32 4294967295, %s1747_s26   ;;  %p1073_p0 = scmp.ge.s32.totalorder %s1747_s26, 1  ;;  %s1747_s26 = sphi %s1808_s26, %s27_s26   ;;  %s1743_s25 = sphi %s1806_s25, %s2306_s25   ;;  %s1739_s24 = sphi %s1804_s24, %s2305_s24   ;;  %s1735_s23 = sphi %s1802_s23, %s2304_s23   ;;  %s1731_s22 = sphi %s1800_s22, %s2303_s22   ;;  %s1727_s21 = sphi %s1798_s21, %s2302_s21  }
  0x10   : > { %p2267_p1 = scmp.eq.s32.totalorder %s1829_s27, 0  ;;  %p210_p2 = scmp.lt.s32.totalorder %s1747_s26, 3 }
  0x11   : > { %s1749_s29 = smov [#allocation8]   ;;  %s1750_s8 = smov [#allocation9]  }
  0x12   : > { %p1834_p3 = pnand %p1073_p0, %p210_p2  ;;  %s222_s30 = sshll.u32 %s1749_s29, 4  ;;  %s1838_s30 = int_to_ptr.vmem [resolvable:$true] %s222_s30 }
  0x13   : > { %s236_s9 = sshll.u32 %s1750_s8, 4  ;;  %s1751_s10 = smov [#allocation11]   ;;  %s1849_s9 = int_to_ptr.vmem [resolvable:$true] %s236_s9 }
  0x14   : > { %s2276_s28 = scalar_select %p1834_p3, 1, 0 }
  0x15   : > { %p1380_p4 = pneg %p1834_p3  ;;  %s1851_s11 = sshll.u32 %s1751_s10, 4  ;;  %s247_s11 = int_to_ptr.vmem [resolvable:$true] %s1851_s11 }
  0x16   : > { %s2278_s2 = sld [smem:[#allocation22_spill]] }
  0x17   : > { %p1845_p6 = pnand %p1380_p4, %p2267_p1 }
  0x19   : > { %p1861_p8 = pneg %p1845_p6 }
  0x1c   : > { %s1477_s14 = scalar_lea.hbm %s2278_s2, 2048 }
  0x1d   : > { %p1478_p7 = scmp.ne.s32.totalorder %s2278_s2, %s1477_s14  ;;  %p1484_p11 = scmp.lt.u32.totalorder %s1477_s14, %s2278_s2 }
  0x1f   : > { %p1480_p9 = pnand %p1861_p8, %p1478_p7 }
  0x21   : > { %p1481_p10 = pneg %p1480_p9 }
  0x23   : > { %p1486_p12 = pnand %p1484_p11, %p1481_p10 }
  0x25   : > { %1489 = shalt.err (!%p1486_p12)
}
  0x26   : > { %s1490_s20 = scalar_lea.vmem %s1838_s30, 2048  ;;  %p1498_p4 = scmp.lt.s32.totalorder %s1838_s30, %s1838_s30 }
  0x27   : > { %p1491_p13 = scmp.ne.s32.totalorder %s1838_s30, %s1490_s20  ;;  %p1499_p5 = scmp.lt.s32.totalorder %s1490_s20, %s1490_s20 }
  0x29   : > { %p1493_p0 = pnand %p1491_p13, %p1861_p8  ;;  %p1500_p7 = por %p1499_p5, %p1498_p4 }
  0x2b   : > { %p1494_p2 = pneg %p1493_p0 }
  0x2d   : > { %p1501_p9 = pnand %p1500_p7, %p1494_p2 }
  0x2f   : > { %1504 = shalt.err (!%p1501_p9)
}
  0x30   : > { %s2269_s29 = smov 128   ;;  %s2270_s8 = smov 8  }
  0x31   : > { %1383 = dma.hbm_to_vmem [thread:$0]  (!%p1845_p6), %s2278_s2, 2048, %s1838_s30, [#allocation7], %s2269_s29, %s2269_s29, %s2270_s8  }
  0x32   : > { %s2280_s3 = sld [smem:[#allocation23_spill]] }
  0x38   : > { %s1505_s15 = scalar_lea.hbm %s2280_s3, 16 }
  0x39   : > { %p1506_p5 = scmp.ne.s32.totalorder %s2280_s3, %s1505_s15  ;;  %p1512_p12 = scmp.lt.u32.totalorder %s1505_s15, %s2280_s3 }
  0x3b   : > { %p1508_p10 = pnand %p1506_p5, %p1861_p8 }
  0x3d   : > { %p1509_p11 = pneg %p1508_p10 }
  0x3f   : > { %p1514_p13 = pnand %p1512_p12, %p1509_p11 }
  0x41   : > { %1517 = shalt.err (!%p1514_p13)
}
  0x42   : > { %s1518_s30 = scalar_lea.vmem %s1849_s9, 16  ;;  %s1525_s10 = scalar_lea.vmem %s1849_s9, 32 }
  0x43   : > { %p1519_p0 = scmp.ne.s32.totalorder %s1849_s9, %s1518_s30  ;;  %p1526_p7 = scmp.lt.s32.totalorder %s1849_s9, %s1849_s9 }
  0x44   : > { %p1527_p9 = scmp.lt.s32.totalorder %s1525_s10, %s1518_s30 }
  0x45   : > { %p1521_p2 = pnand %p1519_p0, %p1861_p8 }
  0x46   : > { %p1528_p5 = por %p1527_p9, %p1526_p7 }
  0x47   : > { %p1522_p4 = pneg %p1521_p2 }
  0x49   : > { %p1529_p10 = pnand %p1528_p5, %p1522_p4 }
  0x4b   : > { %1532 = shalt.err (!%p1529_p10)
}
  0x4c   : > { %1386 = dma.hbm_to_vmem [thread:$0]  (!%p1845_p6), %s2280_s3, 16, %s1849_s9, [#allocation10]  }
  0x4d   : > { %s2281_s4 = sld [smem:[#allocation24_spill]] }
  0x53   : > { %s1533_s16 = scalar_lea.hbm %s2281_s4, 4096 }
  0x54   : > { %p1534_p11 = scmp.ne.s32.totalorder %s2281_s4, %s1533_s16  ;;  %p1540_p0 = scmp.lt.u32.totalorder %s1533_s16, %s2281_s4 }
  0x56   : > { %p1536_p12 = pnand %p1534_p11, %p1861_p8 }
  0x58   : > { %p1537_p13 = pneg %p1536_p12 }
  0x5a   : > { %p1542_p2 = pnand %p1540_p0, %p1537_p13 }
  0x5c   : > { %1545 = shalt.err (!%p1542_p2)
}
  0x5d   : > { %s1546_s10 = scalar_lea.vmem %s247_s11, 4096  ;;  %p1554_p5 = scmp.lt.s32.totalorder %s247_s11, %s247_s11 }
  0x5e   : > { %p1547_p4 = scmp.ne.s32.totalorder %s247_s11, %s1546_s10  ;;  %p1555_p10 = scmp.lt.s32.totalorder %s1546_s10, %s1546_s10 }
  0x60   : > { %p1549_p7 = pnand %p1547_p4, %p1861_p8  ;;  %p1556_p1 = por %p1555_p10, %p1554_p5 }
  0x62   : > { %p1550_p9 = pneg %p1549_p7 }
  0x64   : > { %p1557_p3 = pnand %p1556_p1, %p1550_p9 }
  0x66   : > { %1560 = shalt.err (!%p1557_p3)
}
  0x67   : > { %s1754_s9 = smov 256   ;;  %s1755_s12 = smov 16  }
  0x68   : > { %1389 = dma.hbm_to_vmem [thread:$0]  (!%p1845_p6), %s2281_s4, 4096, %s247_s11, [#allocation10], %s1754_s9, %s1754_s9, %s1755_s12  }
  0x69   : > { %s1756_s15 = smov [#allocation12]   ;;  %s1561_s20 = scalar_lea.hbm %s2265_s5, 32 }
  0x6a   : > { %s260_s16 = sshll.u32 %s1756_s15, 4  ;;  %p1562_p1 = scmp.ne.s32.totalorder %s2265_s5, %s1561_s20  ;;  %s261_s16 = int_to_ptr.vmem [resolvable:$true] %s260_s16 }
  0x6b   : > { %p1568_p12 = scmp.lt.u32.totalorder %s1561_s20, %s2265_s5 }
  0x6c   : > { %p1564_p3 = pnand %p1562_p1, %p1861_p8 }
  0x6e   : > { %p1565_p11 = pneg %p1564_p3 }
  0x70   : > { %p1570_p13 = pnand %p1568_p12, %p1565_p11 }
  0x72   : > { %1573 = shalt.err (!%p1570_p13)
}
  0x73   : > { %s1574_s11 = scalar_lea.vmem %s261_s16, 32  ;;  %p1582_p7 = scmp.lt.s32.totalorder %s261_s16, %s261_s16 }
  0x74   : > { %p1575_p0 = scmp.ne.s32.totalorder %s261_s16, %s1574_s11  ;;  %p1583_p9 = scmp.lt.s32.totalorder %s1574_s11, %s1574_s11 }
  0x76   : > { %p1577_p2 = pnand %p1575_p0, %p1861_p8  ;;  %p1584_p5 = por %p1583_p9, %p1582_p7 }
  0x78   : > { %p1578_p4 = pneg %p1577_p2 }
  0x7a   : > { %p1585_p10 = pnand %p1584_p5, %p1578_p4 }
  0x7c   : > { %1588 = shalt.err (!%p1585_p10)
}
  0x7d   : > { %1392 = dma.hbm_to_vmem [thread:$0]  (!%p1845_p6), %s2265_s5, 32, %s261_s16, [#allocation13]  }
  0x7e   : > { %s1072_s17 = sadd.s32 4294967294, %s1747_s26   ;;  %s39_s29 = sadd.s32 1, %s1743_s25 }
  0x7f   : > { %p41_p8 = scmp.ge.s32.totalorder %s39_s29, 2  ;;  %s48_s7 = sadd.s32 1, %s1735_s23 }
  0x80   : > { %p55_p1 = scmp.ne.s32.totalorder %s1735_s23, %s1731_s22  ;;  %p56_p3 = scmp.eq.s32.totalorder %s1747_s26, 0 }
  0x81   : > { %s2308_s29 = smov (%p41_p8, %s39_s29), 0  ;;  %p61_p12 = scmp.ne.s32.totalorder %s1731_s22, %s1727_s21 }
  0x82   : > { %p1954_p11 = por %p56_p3, %p55_p1  ;;  %s43_s13 = ssub.s32 %s1743_s25, %s2308_s29 }
  0x83   : > { %p197_p6 = scmp.eq.s32.totalorder %s1829_s27, 1  ;;  %p46_p13 = scmp.eq.s32.totalorder %s43_s13, 0 }
  0x84   : > { %p2283_p0 = scmp.eq.s32.totalorder %s1829_s27, 0  ;;  %p203_p7 = scmp.eq.s32.totalorder %s1072_s17, 1 }
  0x85   : > { %p1969_p4 = por %p197_p6, %p55_p1  ;;  %p1408_p5 = scmp.lt.s32.totalorder %s1747_s26, 2 }
  0x86   : > { %p1965_p2 = por %p2283_p0, %p61_p12  ;;  %p1976_p9 = por %p203_p7, %p61_p12 }
  0x87   : > { %s2285_s15 = scalar_select %p1969_p4, 1, 0 }
  0x88   : > { %s1974_s16 = scalar_select %p46_p13, %s1735_s23, %s48_s7  }
  0x89   : > { %s2286_s18 = scalar_select %p1976_p9, 1, 0 }
  0x8a   : > { %s1982_s19 = sand.u32 1, %s1735_s23   ;;  %s1080_s20 = sshll.u32 %s1743_s25, 7 }
  0x8b   : > { %s1079_s30 = sshll.u32 %s1982_s19, 3  ;;  %s2287_s0 = sld [smem:[#allocation21_spill]] }
  0x8c   : > { %s275_s12 = scalar_lea.vmem [#allocation3], %s1079_s30  ;;  %p1993_p10 = pnand %p1408_p5, %p1954_p11 }
  0x8d   : > { %s283_s17 = sshll.u32 %s275_s12, 4  ;;  %s272_s2 = scalar_lea.sflag [#allocation4], %s1982_s19  ;;  %s1997_s17 = int_to_ptr.vmem [resolvable:$true] %s283_s17 }
  0x8e   : > { %p1591_p1 = pneg %p1993_p10 }
  0x91   : > { %s1989_s9 = scalar_lea.hbm %s2287_s0, %s1080_s20  ;;  %s1594_s30 = scalar_lea.hbm %s2287_s0, 256 }
  0x92   : > { %s1589_s10 = scalar_lea.hbm %s1989_s9, 128  ;;  %p1595_p11 = scmp.lt.u32.totalorder %s1989_s9, %s2287_s0 }
  0x93   : > { %p1590_p8 = scmp.ne.s32.totalorder %s1989_s9, %s1589_s10  ;;  %p1596_p6 = scmp.lt.u32.totalorder %s1594_s30, %s1589_s10 }
  0x94   : > { %p1598_p0 = scmp.lt.u32.totalorder %s1589_s10, %s1989_s9 }
  0x95   : > { %p1592_p3 = pnand %p1591_p1, %p1590_p8  ;;  %p1597_p13 = por %p1596_p6, %p1595_p11 }
  0x97   : > { %p1593_p12 = pneg %p1592_p3  ;;  %p1599_p7 = por %p1598_p0, %p1597_p13 }
  0x99   : > { %p1600_p5 = pnand %p1599_p7, %p1593_p12 }
  0x9b   : > { %1603 = shalt.err (!%p1600_p5)
}
  0x9c   : > { %s1604_s13 = scalar_lea.vmem %s1997_s17, 128  ;;  %s1757_s20 = smov [#allocation3]  }
  0x9d   : > { %p1605_p8 = scmp.ne.s32.totalorder %s1997_s17, %s1604_s13  ;;  %s1609_s8 = sshll.u32 %s1757_s20, 4  ;;  %s1610_s8 = int_to_ptr.vmem [resolvable:$false] %s1609_s8 }
  0x9e   : > { %s1611_s11 = scalar_lea.vmem %s1610_s8, 256  ;;  %p1612_p4 = scmp.lt.s32.totalorder %s1997_s17, %s1610_s8 }
  0x9f   : > { %p1607_p3 = pnand %p1605_p8, %p1591_p1  ;;  %p1613_p11 = scmp.lt.s32.totalorder %s1611_s11, %s1604_s13 }
  0xa1   : > { %p1608_p9 = pneg %p1607_p3  ;;  %p1614_p6 = por %p1613_p11, %p1612_p4 }
  0xa3   : > { %p1615_p13 = pnand %p1614_p6, %p1608_p9 }
  0xa5   : > { %1618 = shalt.err (!%p1615_p13)
}
  0xa6   : > { %1396 = dma.hbm_to_vmem [thread:$0]  (!%p1993_p10), %s1989_s9, 128, %s1997_s17, %s272_s2  }
  0xa7   : > { %s1097_s10 = sshll.u32 %s1743_s25, 11  ;;  %s2289_s30 = sshll.u32 %s1982_s19, 7 }
  0xa8   : > { %s294_s12 = scalar_lea.vmem [#allocation6], %s2289_s30  ;;  %s290_s8 = sand.u32 1, %s1747_s26  }
  0xa9   : > { %s301_s20 = sshll.u32 %s294_s12, 4  ;;  %s2035_s0 = scalar_lea.hbm %s2261_s1, %s1097_s10  ;;  %s2029_s20 = int_to_ptr.vmem [resolvable:$true] %s301_s20 }
  0xaa   : > { %s2037_s3 = scalar_lea.sflag [#allocation7], %s290_s8  ;;  %s1619_s4 = scalar_lea.hbm %s2035_s0, 2048 }
  0xab   : > { %p1620_p4 = scmp.ne.s32.totalorder %s2035_s0, %s1619_s4  ;;  %s1624_s9 = scalar_lea.hbm %s2261_s1, 4096 }
  0xac   : > { %p1625_p0 = scmp.lt.u32.totalorder %s2035_s0, %s2261_s1  ;;  %p1626_p7 = scmp.lt.u32.totalorder %s1624_s9, %s1619_s4 }
  0xad   : > { %p1622_p9 = pnand %p1620_p4, %p1591_p1  ;;  %p1628_p8 = scmp.lt.u32.totalorder %s1619_s4, %s2035_s0 }
  0xae   : > { %p1627_p5 = por %p1626_p7, %p1625_p0 }
  0xaf   : > { %p1623_p12 = pneg %p1622_p9 }
  0xb0   : > { %p1629_p3 = por %p1628_p8, %p1627_p5 }
  0xb2   : > { %p1630_p11 = pnand %p1629_p3, %p1623_p12 }
  0xb4   : > { %1633 = shalt.err (!%p1630_p11)
}
  0xb5   : > { %s1634_s10 = scalar_lea.vmem %s2029_s20, 2048  ;;  %s1758_s12 = smov [#allocation6]  }
  0xb6   : > { %p1635_p6 = scmp.ne.s32.totalorder %s2029_s20, %s1634_s10  ;;  %s1639_s8 = sshll.u32 %s1758_s12, 4  ;;  %s1640_s8 = int_to_ptr.vmem [resolvable:$false] %s1639_s8 }
  0xb7   : > { %s1641_s13 = scalar_lea.vmem %s1640_s8, 4096  ;;  %p1642_p9 = scmp.lt.s32.totalorder %s2029_s20, %s1640_s8 }
  0xb8   : > { %p1637_p13 = pnand %p1635_p6, %p1591_p1  ;;  %p1643_p0 = scmp.lt.s32.totalorder %s1641_s13, %s1634_s10 }
  0xba   : > { %p1638_p4 = pneg %p1637_p13  ;;  %p1644_p7 = por %p1643_p0, %p1642_p9 }
  0xbc   : > { %p1645_p5 = pnand %p1644_p7, %p1638_p4 }
  0xbe   : > { %1648 = shalt.err (!%p1645_p5)
}
  0xbf   : > { %s2290_s4 = smov 8   ;;  %s2291_s11 = smov 128  }
  0xc0   : > { %1399 = dma.hbm_to_vmem [thread:$0]  (!%p1993_p10), %s2035_s0, 2048, %s2029_s20, %s2037_s3, %s2291_s11, %s2291_s11, %s2290_s4  }
  0xc1   : > { %p2292_p1 = scmp.ne.s32.totalorder %s2276_s28, 0 }
  0xc2   : > { %s2069_s2 = sand.u32 (!%p2292_p1), 1, %s1731_s22  }
  0xc3   : > { %313 = sbr.rel (%p2292_p1) target bundleno = 1286 (0x506), region = 44  ;;  %s1085_s19 = sshll.u32 (!%p2292_p1), %s2069_s2, 3 }
  0xc4   : > { %s316_s9 = scalar_lea.sflag (!%p2292_p1), [#allocation4], %s2069_s2  ;;  %s2075_s7 = scalar_lea.vmem (!%p2292_p1), [#allocation3], %s1085_s19 }
  0xca   : > { %1702 = dma.done.wait (%p1965_p2), %s316_s9, 128  }
  0xcb   : > { %1704 = vsyncadd (%p1965_p2), %s316_s9, 4294967168  ;;  %s324_s0 = sand.u32 1, %s1829_s27   ;;  %s1086_s3 = sshll.u32 %s2069_s2, 7 }
  0xcc   : > { %s325_s28 = scalar_lea.sflag [#allocation7], %s324_s0  ;;  %s2083_s20 = scalar_lea.vmem [#allocation6], %s1086_s3 }
  0xcd   : > { %1706 = dma.done.wait (%p1965_p2), %s325_s28, 2048  }
  0xce   : > { %1708 = vsyncadd (%p1965_p2), %s325_s28, 4294965248  ;;  %p2293_p10 = scmp.eq.s32.totalorder %s1829_s27, 0 }
  0xd0   : > { %1710 = dma.done.wait (%p2293_p10), [#allocation7], 2048   ;;  %p2294_p12 = pmov %p2293_p10 }
  0xd1   : > { %p2295_p8 = pmov %p2293_p10 }
  0xd2   : > { %1712 = vsyncadd (%p2294_p12), [#allocation7], 4294965248 }
  0xd3   : > { %1714 = dma.done.wait (%p2295_p8), [#allocation10], 4112   ;;  %p2296_p3 = pmov %p2295_p8 }
  0xd5   : > { %1716 = vsyncadd (%p2296_p3), [#allocation10], 4294963184  ;;  %p2297_p11 = pmov %p2296_p3 }
  0xd6   : > { %p2298_p6 = pmov %p2296_p3 }
  0xd7   : > { %1718 = dma.done.wait (%p2297_p11), [#allocation13], 32  }
  0xd8   : > { %1720 = vsyncadd (%p2298_p6), [#allocation13], 4294967264  ;;  %v1759_v0 = vmov 0.0   ;;  %v1760_v1 = vmov 0.0|0.0   ;;  %vm1761_vm0 = vmmov 0   ;;  %v399_v2 = vld [vmem:[#allocation11 + $0x8] sm:$0xff] }
  0xd9   : > { %506 = vmatprep.mubr.f32.mxu0 %v1759_v0  ;;  %1286 = vmatprep.subr.bf16.mxu1 %v1760_v1  ;;  %v401_v3 = vld [vmem:[#allocation11 + $0x18] sm:$0xff]  ;;  %v398_v4 = vld [vmem:[#allocation11] sm:$0xff]  ;;  %v400_v6 = vld [vmem:[#allocation11 + $0x10] sm:$0xff]  ;;  %s377_s27 = scalar_lea.vmem [#allocation14], %s1085_s19  ;;  %s1094_s17 = sshll.u32 %s1739_s24, 7 }
  0xda   : > { %1181 = vmatprep.mubr.msk.f32.mxu1 %vm1761_vm0, %v1759_v0  ;;  %v1254_v5 = vpack.c.bf16 %v401_v3, %v399_v2  ;;  %v403_v7 = vld [vmem:[#allocation11 + $0x28] sm:$0xff]  ;;  %v405_v8 = vld [vmem:[#allocation11 + $0x38] sm:$0xff]  ;;  %v1256_v9 = vpack.c.bf16 %v400_v6, %v398_v4  ;;  %v402_v11 = vld [vmem:[#allocation11 + $0x20] sm:$0xff]  ;;  %s930_s14 = sshll.u32 %s377_s27, 4  ;;  %s2213_s12 = scalar_lea.hbm %s2266_s6, %s1094_s17  ;;  %s2208_s14 = int_to_ptr.vmem [resolvable:$true] %s930_s14 }
  0xdb   : > { %v1258_v10 = vpack.c.bf16 %v405_v8, %v403_v7  ;;  %v404_v12 = vld [vmem:[#allocation11 + $0x30] sm:$0xff]  ;;  %v407_v13 = vld [vmem:[#allocation11 + $0x48] sm:$0xff]  ;;  %v409_v14 = vld [vmem:[#allocation11 + $0x58] sm:$0xff]  ;;  %s916_s8 = scalar_lea.sflag [#allocation5], %s2069_s2  ;;  %s1649_s13 = scalar_lea.vmem %s2208_s14, 128 }
  0xdc   : > { %1255 = vmatprep.subr.bf16.mxu0 %v1254_v5  ;;  %v1260_v15 = vpack.c.bf16 %v404_v12, %v402_v11  ;;  %v1262_v16 = vpack.c.bf16 %v409_v14, %v407_v13  ;;  %v406_v17 = vld [vmem:[#allocation11 + $0x40] sm:$0xff]  ;;  %v408_v18 = vld [vmem:[#allocation11 + $0x50] sm:$0xff]  ;;  %v411_v19 = vld [vmem:[#allocation11 + $0x68] sm:$0xff]  ;;  %p1650_p2 = scmp.ne.s32.totalorder %s2208_s14, %s1649_s13  ;;  %p2299_p13 = scmp.ne.s32.totalorder %s2285_s15, 0 }
  0xdd   : > { %1257 = vmatpush1.bf16.msra.mxu0 %v1256_v9  ;;  %v413_v20 = vld [vmem:[#allocation11 + $0x78] sm:$0xff]  ;;  %v1264_v21 = vpack.c.bf16 %v408_v18, %v406_v17  ;;  %v410_v23 = vld [vmem:[#allocation11 + $0x60] sm:$0xff]  ;;  %v412_v24 = vld [vmem:[#allocation11 + $0x70] sm:$0xff]  ;;  %s1762_s24 = smov [#allocation14]  }
  0xde   : > { %1259 = vmatprep.subr.bf16.mxu0 %v1258_v10  ;;  %v1266_v22 = vpack.c.bf16 %v413_v20, %v411_v19  ;;  %v415_v25 = vld [vmem:[#allocation11 + $0x88] sm:$0xff]  ;;  %v417_v26 = vld [vmem:[#allocation11 + $0x98] sm:$0xff]  ;;  %v1268_v27 = vpack.c.bf16 %v412_v24, %v410_v23  ;;  %v414_v29 = vld [vmem:[#allocation11 + $0x80] sm:$0xff]  ;;  %p1651_p4 = pnand %p1650_p2, %p2299_p13  ;;  %s1653_s4 = sshll.u32 %s1762_s24, 4  ;;  %s1654_s4 = int_to_ptr.vmem [resolvable:$false] %s1653_s4 }
  0xdf   : > { %v1270_v28 = vpack.c.bf16 %v417_v26, %v415_v25  ;;  %v416_v30 = vld [vmem:[#allocation11 + $0x90] sm:$0xff]  ;;  %v419_v31 = vld [vmem:[#allocation11 + $0xa8] sm:$0xff]  ;;  %v421_v32 = vld [vmem:[#allocation11 + $0xb8] sm:$0xff]  ;;  %s1655_s11 = scalar_lea.vmem %s1654_s4, 256  ;;  %p1656_p0 = scmp.lt.s32.totalorder %s2208_s14, %s1654_s4 }
  0xe0   : > { %v636_v33 = vld [vmem:[#allocation8] sm:$0xff]  ;;  %v637_v34 = vld [vmem:[#allocation8 + $0x8] sm:$0xff]  ;;  %v638_v36 = vld [vmem:[#allocation8 + $0x10] sm:$0xff]  ;;  %v1272_v38 = vpack.c.bf16 %v416_v30, %v414_v29  ;;  %v1274_v39 = vpack.c.bf16 %v421_v32, %v419_v31  ;;  %v432_v29 = vlaneseq  ;;  %p1652_p9 = pneg %p1651_p4  ;;  %p1657_p7 = scmp.lt.s32.totalorder %s1655_s11, %s1649_s13 }
  0xe1   : > { %1261 = vmatpush1.bf16.msra.mxu0 %v1260_v15  ;;  %v1287_v35 = vpack.c.bf16 %v637_v34, %v636_v33  ;;  %v639_v37 = vld [vmem:[#allocation8 + $0x18] sm:$0xff]  ;;  %v418_v40 = vld [vmem:[#allocation11 + $0xa0] sm:$0xff]  ;;  %v423_v42 = vld [vmem:[#allocation11 + $0xc8] sm:$0xff] }
  0xe2   : > { %1263 = vmatprep.subr.bf16.mxu0 %v1262_v16  ;;  %v420_v41 = vld [vmem:[#allocation11 + $0xb0] sm:$0xff]  ;;  %v1290_v43 = vpack.c.bf16 %v639_v37, %v638_v36  ;;  %v425_v44 = vld [vmem:[#allocation11 + $0xd8] sm:$0xff]  ;;  %v641_v46 = vld [vmem:[#allocation8 + $0x28] sm:$0xff]  ;;  %v433_v30 = vshrl.u32 %v432_v29, 7  ;;  %p1658_p5 = por %p1657_p7, %p1656_p0 }
  0xe3   : > { %1288 = vmatpush3.bf16.msra.mxu1 %v1287_v35  ;;  %v640_v45 = vld [vmem:[#allocation8 + $0x20] sm:$0xff]  ;;  %v1276_v47 = vpack.c.bf16 %v420_v41, %v418_v40  ;;  %v1278_v48 = vpack.c.bf16 %v425_v44, %v423_v42  ;;  %v424_v50 = vld [vmem:[#allocation11 + $0xd0] sm:$0xff]  ;;  %v427_v51 = vld [vmem:[#allocation11 + $0xe8] sm:$0xff] }
  0xe4   : > { %1289 = vmatprep.subr.bf16.mxu1 %v1760_v1  ;;  %v422_v49 = vld [vmem:[#allocation11 + $0xc0] sm:$0xff]  ;;  %v1293_v52 = vpack.c.bf16 %v641_v46, %v640_v45  ;;  %v429_v53 = vld [vmem:[#allocation11 + $0xf8] sm:$0xff]  ;;  %v642_v54 = vld [vmem:[#allocation8 + $0x30] sm:$0xff]  ;;  %v434_v31 = vsub.s32 0, %v433_v30  ;;  %v438_v33 = vsub.s32 1, %v433_v30  ;;  %p1659_p1 = pnand %p1658_p5, %p1652_p9 }
  0xe5   : > { %1265 = vmatpush1.bf16.msra.mxu0 %v1264_v21  ;;  %v643_v55 = vld [vmem:[#allocation8 + $0x38] sm:$0xff]  ;;  %v1280_v56 = vpack.c.bf16 %v424_v50, %v422_v49  ;;  %v1282_v57 = vpack.c.bf16 %v429_v53, %v427_v51  ;;  %v426_v58 = vld [vmem:[#allocation11 + $0xe0] sm:$0xff]  ;;  %v646_v3 = vld [vmem:[#allocation8 + $0x50] sm:$0xff] }
  0xe6   : > { %1267 = vmatprep.subr.bf16.mxu0 %v1266_v22  ;;  %v428_v59 = vld [vmem:[#allocation11 + $0xf0] sm:$0xff]  ;;  %v1296_v60 = vpack.c.bf16 %v643_v55, %v642_v54  ;;  %v644_v61 = vld [vmem:[#allocation8 + $0x40] sm:$0xff]  ;;  %v645_v62 = vld [vmem:[#allocation8 + $0x48] sm:$0xff] }
  0xe7   : > { %1291 = vmatpush3.bf16.msra.mxu1 %v1290_v43  ;;  %v1284_v63 = vpack.c.bf16 %v428_v59, %v426_v58  ;;  %v1299_v2 = vpack.c.bf16 %v645_v62, %v644_v61  ;;  %v647_v4 = vld [vmem:[#allocation8 + $0x58] sm:$0xff]  ;;  %v382_v5 = vld [vmem:[%s2083_s20] sm:$0xff]  ;;  %v649_v8 = vld [vmem:[#allocation8 + $0x68] sm:$0xff] }
  0xe8   : > { %1292 = vmatprep.subr.bf16.mxu1 %v1760_v1  ;;  %v1302_v6 = vpack.c.bf16 %v647_v4, %v646_v3  ;;  %v648_v7 = vld [vmem:[#allocation8 + $0x60] sm:$0xff]  ;;  %v383_v9 = vld [vmem:[%s2083_s20 + $0x8] sm:$0xff]  ;;  %v650_v11 = vld [vmem:[#allocation8 + $0x70] sm:$0xff] }
  0xe9   : > { %1269 = vmatpush1.bf16.msra.mxu0 %v1268_v27  ;;  %v1305_v10 = vpack.c.bf16 %v649_v8, %v648_v7  ;;  %v651_v12 = vld [vmem:[#allocation8 + $0x78] sm:$0xff]  ;;  %v384_v13 = vld [vmem:[%s2083_s20 + $0x10] sm:$0xff]  ;;  %v386_v17 = vld [vmem:[%s2083_s20 + $0x20] sm:$0xff] }
  0xea   : > { %1271 = vmatprep.subr.bf16.mxu0 %v1270_v28  ;;  %v1308_v14 = vpack.c.bf16 %v651_v12, %v650_v11  ;;  %v385_v15 = vld [vmem:[%s2083_s20 + $0x18] sm:$0xff]  ;;  %v387_v18 = vld [vmem:[%s2083_s20 + $0x28] sm:$0xff]  ;;  %v388_v19 = vld [vmem:[%s2083_s20 + $0x30] sm:$0xff] }
  0xeb   : > { %1294 = vmatpush3.bf16.msra.mxu1 %v1293_v52  ;;  %v635_v16 = vld [vmem:[%s2075_s7] sm:$0xff]  ;;  %v390_v21 = vld [vmem:[%s2083_s20 + $0x40] sm:$0xff]  ;;  %v391_v22 = vld [vmem:[%s2083_s20 + $0x48] sm:$0xff] }
  0xec   : > { %1295 = vmatprep.subr.bf16.mxu1 %v1760_v1  ;;  %v389_v20 = vld [vmem:[%s2083_s20 + $0x38] sm:$0xff]  ;;  %v392_v23 = vld [vmem:[%s2083_s20 + $0x50] sm:$0xff]  ;;  %v394_v25 = vld [vmem:[%s2083_s20 + $0x60] sm:$0xff] }
  0xed   : > { %1273 = vmatpush1.bf16.msra.mxu0 %v1272_v38  ;;  %v393_v24 = vld [vmem:[%s2083_s20 + $0x58] sm:$0xff]  ;;  %v395_v26 = vld [vmem:[%s2083_s20 + $0x68] sm:$0xff]  ;;  %v396_v27 = vld [vmem:[%s2083_s20 + $0x70] sm:$0xff] }
  0xee   : > { %1275 = vmatprep.subr.bf16.mxu0 %v1274_v39  ;;  %v397_v28 = vld [vmem:[%s2083_s20 + $0x78] sm:$0xff]  ;;  %v430_v32 = vld [vmem:[#allocation12] sm:$0x3] }
  0xef   : > { %1297 = vmatpush3.bf16.msra.mxu1 %v1296_v60  ;;  %v2151_v35 = vrot.slane %v430_v32, %v434_v31  ;;  %v2153_v37 = vrot.slane %v430_v32, %v438_v33 }
  0xf0   : > { %1298 = vmatprep.subr.bf16.mxu1 %v1760_v1 }
  0xf1   : > { %1277 = vmatpush1.bf16.msra.mxu0 %v1276_v47 }
  0xf2   : > { %1279 = vmatprep.subr.bf16.mxu0 %v1278_v48 }
  0xf3   : > { %1300 = vmatpush3.bf16.msra.mxu1 %v1299_v2 }
  0xf4   : > { %1301 = vmatprep.subr.bf16.mxu1 %v1760_v1 }
  0xf5   : > { %1281 = vmatpush1.bf16.msra.mxu0 %v1280_v56 }
  0xf6   : > { %1283 = vmatprep.subr.bf16.mxu0 %v1282_v57 }
  0xf7   : > { %1303 = vmatpush3.bf16.msra.mxu1 %v1302_v6 }
  0xf8   : > { %1304 = vmatprep.subr.bf16.mxu1 %v1760_v1 }
  0xf9   : > { %1285 = vmatpush1.bf16.msra.mxu0 %v1284_v63 }
  0xfa   : > { %1310 = vmatprep.subr.bf16.mxu0 %v1760_v1 }
  0xfb   : > { %1306 = vmatpush3.bf16.msra.mxu1 %v1305_v10 }
  0xfc   : > { %507 = vmatmul.mubr.f32.vlgmr.msra.gmra.mrb[0].mxu0 %v382_v5  ;;  %1307 = vmatprep.subr.bf16.mxu1 %v1760_v1 }
  0xfd   : > { %512 = vmatprep.mubr.f32.mxu0 %v1759_v0 }
  0xff   : > { %1309 = vmatpush3.bf16.msra.mxu1 %v1308_v14 }
 0x100   : > { %513 = vmatmul.mubr.f32.gmra.mrb[2].mxu0 %v383_v9  ;;  %1334 = vmatprep.subr.bf16.mxu1 %v1760_v1 }
 0x101   : > { %518 = vmatprep.mubr.f32.mxu0 %v1759_v0 }
 0x102   : > { %1182 = vmatmul.mubr.f32.vlgmr.msra.gmra.mrb[0].mxu1 %v635_v16 }
 0x103   : > { %1251 = vmatprep.mubr.msk.f32.mxu1 %vm1761_vm0, %v1759_v0 }
 0x104   : > { %519 = vmatmul.mubr.f32.gmra.mrb[4].mxu0 %v384_v13 }
 0x105   : > { %524 = vmatprep.mubr.f32.mxu0 %v1759_v0 }
 0x108   : > { %525 = vmatmul.mubr.f32.gmra.mrb[6].mxu0 %v385_v15 }
 0x109   : > { %530 = vmatprep.mubr.f32.mxu0 %v1759_v0 }
 0x10c   : > { %531 = vmatmul.mubr.f32.gmra.mrb[8].mxu0 %v386_v17 }
 0x10d   : > { %536 = vmatprep.mubr.f32.mxu0 %v1759_v0 }
 0x110   : > { %537 = vmatmul.mubr.f32.gmra.mrb[10].mxu0 %v387_v18 }
 0x111   : > { %542 = vmatprep.mubr.f32.mxu0 %v1759_v0 }
 0x114   : > { %543 = vmatmul.mubr.f32.gmra.mrb[12].mxu0 %v388_v19 }
 0x115   : > { %548 = vmatprep.mubr.f32.mxu0 %v1759_v0 }
 0x118   : > { %549 = vmatmul.mubr.f32.gmra.mrb[14].mxu0 %v389_v20 }
 0x119   : > { %554 = vmatprep.mubr.f32.mxu0 %v1759_v0 }
 0x11c   : > { %555 = vmatmul.mubr.f32.gmra.mrb[16].mxu0 %v390_v21 }
 0x11d   : > { %560 = vmatprep.mubr.f32.mxu0 %v1759_v0 }
 0x120   : > { %561 = vmatmul.mubr.f32.gmra.mrb[18].mxu0 %v391_v22 }
 0x121   : > { %566 = vmatprep.mubr.f32.mxu0 %v1759_v0 }
 0x124   : > { %567 = vmatmul.mubr.f32.gmra.mrb[20].mxu0 %v392_v23 }
 0x125   : > { %572 = vmatprep.mubr.f32.mxu0 %v1759_v0 }
 0x128   : > { %573 = vmatmul.mubr.f32.gmra.mrb[22].mxu0 %v393_v24 }
 0x129   : > { %578 = vmatprep.mubr.f32.mxu0 %v1759_v0 }
 0x12c   : > { %579 = vmatmul.mubr.f32.gmra.mrb[24].mxu0 %v394_v25 }
 0x12d   : > { %584 = vmatprep.mubr.f32.mxu0 %v1759_v0 }
 0x130   : > { %585 = vmatmul.mubr.f32.gmra.mrb[26].mxu0 %v395_v26 }
 0x131   : > { %590 = vmatprep.mubr.f32.mxu0 %v1759_v0 }
 0x134   : > { %591 = vmatmul.mubr.f32.gmra.mrb[28].mxu0 %v396_v27 }
 0x135   : > { %596 = vmatprep.mubr.f32.mxu0 %v1759_v0 }
 0x138   : > { %597 = vmatmul.mubr.f32.gmra.mrb[30].mxu0 %v397_v28 }
 0x139   : > { %1216 = vmatprep.mubr.msk.f32.mxu0 %vm1761_vm0, %v1759_v0 }
 0x1cf   : > { %v508_v34 = vpop.f32.mrb[0].mxu0 }
 0x1d0   : > { %v510_v36 = vpop.f32.mrb[1].mxu0  ;;  %v509_v39 = vadd.f32 %v508_v34, %v2151_v35 }
 0x1d1   : > { %v511_v0 = vadd.f32 %v510_v36, %v2153_v37 }
 0x1d3   : > { %v514_v38 = vpop.f32.mrb[2].mxu0 }
 0x1d4   : > { %v515_v40 = vadd.f32 %v514_v38, %v2151_v35  ;;  %v516_v41 = vpop.f32.mrb[3].mxu0 }
 0x1d5   : > { %v517_v42 = vadd.f32 %v516_v41, %v2153_v37  ;;  %v2163_v51 = vpop.f32.mrb[0].mxu1 }
 0x1d6   : > { %v1311_v43 = vpack.c.bf16 %v515_v40, %v509_v39  ;;  %v1183_v54 = vpop.f32.mrb[1].mxu1 }
 0x1d7   : > { %v1335_v44 = vpack.c.bf16 %v517_v42, %v511_v0  ;;  %v520_v45 = vpop.f32.mrb[4].mxu0 }
 0x1d8   : > { %v522_v46 = vpop.f32.mrb[5].mxu0  ;;  %1312 = vmatpush3.bf16.xpose.msra.mxu0 %v1311_v43  ;;  %v521_v48 = vadd.f32 %v520_v45, %v2151_v35 }
 0x1d9   : > { %1336 = vmatpush3.bf16.msra.mxu1 %v1335_v44  ;;  %1313 = vmatprep.subr.bf16.mxu0 %v1760_v1  ;;  %v523_v52 = vadd.f32 %v522_v46, %v2153_v37 }
 0x1da   : > { %1337 = vmatprep.subr.bf16.mxu1 %v1760_v1 }
 0x1db   : > { %v526_v47 = vpop.f32.mrb[6].mxu0 }
 0x1dc   : > { %v527_v49 = vadd.f32 %v526_v47, %v2151_v35  ;;  %v528_v50 = vpop.f32.mrb[7].mxu0 }
 0x1dd   : > { %v529_v53 = vadd.f32 %v528_v50, %v2153_v37 }
 0x1de   : > { %v1314_v55 = vpack.c.bf16 %v527_v49, %v521_v48 }
 0x1df   : > { %v1338_v56 = vpack.c.bf16 %v529_v53, %v523_v52  ;;  %v532_v57 = vpop.f32.mrb[8].mxu0 }
 0x1e0   : > { %v534_v58 = vpop.f32.mrb[9].mxu0  ;;  %1315 = vmatpush3.bf16.xpose.msra.mxu0 %v1314_v55  ;;  %v533_v60 = vadd.f32 %v532_v57, %v2151_v35 }
 0x1e1   : > { %1339 = vmatpush3.bf16.msra.mxu1 %v1338_v56  ;;  %1316 = vmatprep.subr.bf16.mxu0 %v1760_v1  ;;  %v535_v63 = vadd.f32 %v534_v58, %v2153_v37  ;;  %v1092_v58 = vld [vmem:[#allocation9] ss:$0 sm:$0xff] }
 0x1e2   : > { %1340 = vmatprep.subr.bf16.mxu1 %v1760_v1 }
 0x1e3   : > { %v538_v59 = vpop.f32.mrb[10].mxu0 }
 0x1e4   : > { %v539_v61 = vadd.f32 %v538_v59, %v2151_v35  ;;  %v540_v62 = vpop.f32.mrb[11].mxu0  ;;  %v726_v59 = vadd.f32 %v1092_v58, %v2163_v51 }
 0x1e5   : > { %v541_v2 = vadd.f32 %v540_v62, %v2153_v37 }
 0x1e6   : > { %v1317_v3 = vpack.c.bf16 %v539_v61, %v533_v60 }
 0x1e7   : > { %v1341_v4 = vpack.c.bf16 %v541_v2, %v535_v63  ;;  %v544_v5 = vpop.f32.mrb[12].mxu0 }
 0x1e8   : > { %v546_v6 = vpop.f32.mrb[13].mxu0  ;;  %1318 = vmatpush3.bf16.xpose.msra.mxu0 %v1317_v3  ;;  %v545_v8 = vadd.f32 %v544_v5, %v2151_v35 }
 0x1e9   : > { %1342 = vmatpush3.bf16.msra.mxu1 %v1341_v4  ;;  %1319 = vmatprep.subr.bf16.mxu0 %v1760_v1  ;;  %v547_v11 = vadd.f32 %v546_v6, %v2153_v37 }
 0x1ea   : > { %1343 = vmatprep.subr.bf16.mxu1 %v1760_v1 }
 0x1eb   : > { %v550_v7 = vpop.f32.mrb[14].mxu0 }
 0x1ec   : > { %v551_v9 = vadd.f32 %v550_v7, %v2151_v35  ;;  %v552_v10 = vpop.f32.mrb[15].mxu0 }
 0x1ed   : > { %v553_v12 = vadd.f32 %v552_v10, %v2153_v37 }
 0x1ee   : > { %v1320_v13 = vpack.c.bf16 %v551_v9, %v545_v8 }
 0x1ef   : > { %v1344_v14 = vpack.c.bf16 %v553_v12, %v547_v11  ;;  %v556_v15 = vpop.f32.mrb[16].mxu0 }
 0x1f0   : > { %v558_v16 = vpop.f32.mrb[17].mxu0  ;;  %1321 = vmatpush3.bf16.xpose.msra.mxu0 %v1320_v13  ;;  %v557_v18 = vadd.f32 %v556_v15, %v2151_v35 }
 0x1f1   : > { %1345 = vmatpush3.bf16.msra.mxu1 %v1344_v14  ;;  %1322 = vmatprep.subr.bf16.mxu0 %v1760_v1  ;;  %v559_v21 = vadd.f32 %v558_v16, %v2153_v37 }
 0x1f2   : > { %1346 = vmatprep.subr.bf16.mxu1 %v1760_v1 }
 0x1f3   : > { %v562_v17 = vpop.f32.mrb[18].mxu0 }
 0x1f4   : > { %v563_v19 = vadd.f32 %v562_v17, %v2151_v35  ;;  %v564_v20 = vpop.f32.mrb[19].mxu0 }
 0x1f5   : > { %v565_v22 = vadd.f32 %v564_v20, %v2153_v37 }
 0x1f6   : > { %v1323_v23 = vpack.c.bf16 %v563_v19, %v557_v18 }
 0x1f7   : > { %v1347_v24 = vpack.c.bf16 %v565_v22, %v559_v21  ;;  %v568_v25 = vpop.f32.mrb[20].mxu0 }
 0x1f8   : > { %v570_v26 = vpop.f32.mrb[21].mxu0  ;;  %1324 = vmatpush3.bf16.xpose.msra.mxu0 %v1323_v23  ;;  %v569_v28 = vadd.f32 %v568_v25, %v2151_v35 }
 0x1f9   : > { %1348 = vmatpush3.bf16.msra.mxu1 %v1347_v24  ;;  %1325 = vmatprep.subr.bf16.mxu0 %v1760_v1  ;;  %v571_v32 = vadd.f32 %v570_v26, %v2153_v37 }
 0x1fa   : > { %1349 = vmatprep.subr.bf16.mxu1 %v1760_v1 }
 0x1fb   : > { %v574_v27 = vpop.f32.mrb[22].mxu0 }
 0x1fc   : > { %v575_v30 = vadd.f32 %v574_v27, %v2151_v35  ;;  %v576_v31 = vpop.f32.mrb[23].mxu0 }
 0x1fd   : > { %v577_v33 = vadd.f32 %v576_v31, %v2153_v37 }
 0x1fe   : > { %v1326_v34 = vpack.c.bf16 %v575_v30, %v569_v28 }
 0x1ff   : > { %v1350_v36 = vpack.c.bf16 %v577_v33, %v571_v32  ;;  %v580_v38 = vpop.f32.mrb[24].mxu0 }
 0x200   : > { %v582_v39 = vpop.f32.mrb[25].mxu0  ;;  %1327 = vmatpush3.bf16.xpose.msra.mxu0 %v1326_v34  ;;  %v581_v41 = vadd.f32 %v580_v38, %v2151_v35 }
 0x201   : > { %1351 = vmatpush3.bf16.msra.mxu1 %v1350_v36  ;;  %1328 = vmatprep.subr.bf16.mxu0 %v1760_v1  ;;  %v583_v43 = vadd.f32 %v582_v39, %v2153_v37 }
 0x202   : > { %1352 = vmatprep.subr.bf16.mxu1 %v1760_v1 }
 0x203   : > { %v586_v40 = vpop.f32.mrb[26].mxu0 }
 0x204   : > { %v587_v0 = vadd.f32 %v586_v40, %v2151_v35  ;;  %v588_v42 = vpop.f32.mrb[27].mxu0 }
 0x205   : > { %v589_v44 = vadd.f32 %v588_v42, %v2153_v37 }
 0x206   : > { %v1329_v45 = vpack.c.bf16 %v587_v0, %v581_v41 }
 0x207   : > { %v1353_v46 = vpack.c.bf16 %v589_v44, %v583_v43  ;;  %v592_v47 = vpop.f32.mrb[28].mxu0 }
 0x208   : > { %v594_v48 = vpop.f32.mrb[29].mxu0  ;;  %1330 = vmatpush3.bf16.xpose.msra.mxu0 %v1329_v45  ;;  %v593_v50 = vadd.f32 %v592_v47, %v2151_v35 }
 0x209   : > { %1354 = vmatpush3.bf16.msra.mxu1 %v1353_v46  ;;  %1331 = vmatprep.subr.bf16.mxu0 %v1760_v1  ;;  %v595_v54 = vadd.f32 %v594_v48, %v2153_v37 }
 0x20a   : > { %1355 = vmatprep.subr.bf16.mxu1 %v1760_v1  ;;  %v832_v1 = vand.u32 127, %v432_v29 }
 0x20b   : > { %v598_v49 = vpop.f32.mrb[30].mxu0 }
 0x20c   : > { %v599_v52 = vadd.f32 %v598_v49, %v2151_v35  ;;  %v600_v53 = vpop.f32.mrb[31].mxu0  ;;  %vm833_vm1 = vcmp.lt.s32.totalorder %v832_v1, 8 }
 0x20d   : > { %v601_v55 = vadd.f32 %v600_v53, %v2153_v37 }
 0x20e   : > { %v1332_v56 = vpack.c.bf16 %v599_v52, %v593_v50 }
 0x20f   : > { %v1356_v57 = vpack.c.bf16 %v601_v55, %v595_v54 }
 0x210   : > { %1333 = vmatpush3.bf16.xpose.msra.mxu0 %v1332_v56 }
 0x211   : > { %1357 = vmatpush3.bf16.msra.mxu1 %v1356_v57 }
 0x217   : > { %1217 = vmatmul.mubr.f32.vlgmr.msra.gmra.mrb[32].mxu0 %v726_v59 }
 0x2ea   : > { %v827_v60 = vpop.f32.mrb[32].mxu0 }
 0x2eb   : > { %v1218_v61 = vpop.f32.mrb[33].mxu0  ;;  %v834_v35 = vsel %vm833_vm1, %v827_v60, -1e+30 }
 0x2ec   : > { %835 = vmax.xlane.f32.xlu0 %v834_v35 }
 0x379   : > { %v836_v62 = vpop.xlane.xlu0 %835 }
 0x37a   : > { %v837_v63 = vsub.f32 %v834_v35, %v836_v62 }
 0x37c   : > { %v838_v37 = vmul.f32 1.442695, %v837_v63 }
 0x37e   : > { %1473 = vpow2.f32 %v838_v37 }
 0x388   : > { %v1474_v2 = vpop.eup %1473 }
 0x389   : > { %840 = vadd.xlane.f32.xlu0 %v1474_v2 }
 0x416   : > { %v841_v3 = vpop.xlane.xlu0 %840 }
 0x417   : > { %1475 = vrcp.f32 %v841_v3 }
 0x421   : > { %v1476_v51 = vpop.eup %1475 }
 0x422   : > { %v843_v4 = vmul.f32 %v1476_v51, %v1474_v2 }
 0x424   : > { %1252 = vmatmul.mubr.f32.vlgmr.msra.gmra.mrb[2].mxu1 %v843_v4 }
 0x4f7   : > { %v910_v29 = vpop.f32.mrb[2].mxu1 }
 0x4f8   : > { %914 = vst [vmem:[%s377_s27] sm:$0xff] %v910_v29  ;;  %v1253_v5 = vpop.f32.mrb[3].mxu1 }
 0x4f9   : > { %1662 = shalt.err (!%p1659_p1)
}
 0x4fa   : > { %s1663_s2 = scalar_lea.hbm %s2213_s12, 128  ;;  %s1667_s7 = scalar_lea.hbm %s2266_s6, 256 }
 0x4fb   : > { %p1664_p10 = scmp.ne.s32.totalorder %s2213_s12, %s1663_s2  ;;  %p1668_p3 = scmp.lt.u32.totalorder %s2213_s12, %s2266_s6 }
 0x4fc   : > { %p1669_p11 = scmp.lt.u32.totalorder %s1667_s7, %s1663_s2  ;;  %p1671_p2 = scmp.lt.u32.totalorder %s1663_s2, %s2213_s12 }
 0x4fd   : > { %p1665_p12 = pnand %p1664_p10, %p2299_p13 }
 0x4fe   : > { %p1670_p6 = por %p1669_p11, %p1668_p3 }
 0x4ff   : > { %p1666_p8 = pneg %p1665_p12 }
 0x500   : > { %p1672_p4 = por %p1671_p2, %p1670_p6 }
 0x502   : > { %p1673_p9 = pnand %p1672_p4, %p1666_p8 }
 0x504   : > { %1676 = shalt.err (!%p1673_p9)
}
 0x505   : > { %1378 = dma.vmem_to_hbm [thread:$0]  (%p2299_p13), %s2208_s14, 128, %s2213_s12, %s916_s8  }
 0x506 PF: > { %s942_s28 = sand.u32 1, %s1727_s21   ;;  %p2300_p0 = scmp.ne.s32.totalorder %s2286_s18, 0 }
 0x507   : > { %p2301_p7 = scmp.ge.s32.totalorder %s1747_s26, 2  ;;  %s943_s20 = scalar_lea.sflag [#allocation5], %s942_s28 }
 0x509   : > { %p1401_p5 = pnand %p2301_p7, %p2300_p0 }
 0x50b   : > { %1722 = dma.done.wait (!%p1401_p5), %s943_s20, 128  }
 0x50c   : > { %1724 = vsyncadd (!%p1401_p5), %s943_s20, 4294967168  ;;  %s27_s26 = sadd.s32 1, %s1747_s26   ;;  %s2302_s21 = smov %s1731_s22 }
 0x50d   : > { %p24_p1 = scmp.ge.s32.totalorder %s27_s26, 4   ;;  %s2303_s22 = smov %s1735_s23 }
 0x50e   : > { %s2304_s23 = smov %s1974_s16  ;;  %s2305_s24 = smov %s1743_s25 }
 0x50f   : > { %s2306_s25 = smov %s2308_s29  ;;  %26 = sbr.rel (!%p24_p1) target bundleno = 15 (0xf), region = 122 }
 0x516   :  { %948 = vsyncpa [#allocation4], 1 }
 0x517   :  { %950 = vsyncpa [#allocation4 + $0x1], 1 }
 0x518   :  { %951 = vsyncpa [#allocation7], 1 }
 0x519   :  { %953 = vsyncpa [#allocation7 + $0x1], 1 }
 0x51a   :  { %954 = vsyncpa [#allocation10], 1 }
 0x51b   :  { %955 = vsyncpa [#allocation13], 1 }
 0x51c   :  { %956 = vsyncpa [#allocation5], 1 }
 0x51d   :  { %958 = vsyncpa [#allocation5 + $0x1], 1 }

</bundles_post_ra>
